<compile_context>
chip_gen: v7x
topology: tpu7x:2x2x1
jax: 0.10.0
libtpu: 0.0.40
codegen_flags: <defaults>
</compile_context>

<pallas_src>
import jax
import jax.numpy as jnp
from jax.experimental import pallas as pl
from jax.experimental.pallas import tpu as pltpu


def rnn_kernel(x_ref, w_in_ref, w_rec_ref, w_out_ref, b_out_ref, o_ref):
    """Whole-sequence fused RNN forward. Everything resident in VMEM."""
    B, T, I = x_ref.shape
    H = w_rec_ref.shape[0]

    x = x_ref[...]          # (B, T, I)
    w_in = w_in_ref[...]    # (I, H)
    w_rec = w_rec_ref[...]  # (H, H)

    # Hoisted input projection: one (B*T, I) @ (I, H) matmul, off the serial
    # dependence chain (x_t @ W_in^T does not depend on h).
    x_proj = jnp.dot(
        x.reshape(B * T, I), w_in, preferred_element_type=jnp.float32
    ).reshape(B, T, H)

    # Recurrence: fully-unrolled static loop (T is small & static). h_0 = 0, so
    # the first step reduces to ReLU(x_proj_0).
    h = jnp.maximum(x_proj[:, 0, :], 0.0)
    for t in range(1, T):
        pre = x_proj[:, t, :] + jnp.dot(
            h, w_rec, preferred_element_type=jnp.float32
        )
        h = jnp.maximum(pre, 0.0)  # nn.ReLU nonlinearity

    # Linear head folded into the epilogue (O=1 -> single masked store, once).
    o_ref[...] = (
        jnp.dot(h, w_out_ref[...], preferred_element_type=jnp.float32)
        + b_out_ref[...]
    )


def proj_net_forward(x, w_in, w_rec, w_out, b_out):
    """x: (B, T, I) float32. Weights in PyTorch layout:
       w_in (H, I), w_rec (H, H), w_out (O, H), b_out (O,)."""
    B, T, I = x.shape
    O = w_out.shape[0]

    # Pre-transpose weights once (tiny, one-time) so the kernel does plain
    # row-major matmuls. x is NOT transposed (no extra HBM pass).
    w_in_t = w_in.T.astype(jnp.float32)    # (I, H)
    w_rec_t = w_rec.T.astype(jnp.float32)  # (H, H)
    w_out_t = w_out.T.astype(jnp.float32)  # (H, O)
    b = b_out.reshape(1, O).astype(jnp.float32)
    x = x.astype(jnp.float32)

    vmem = pl.BlockSpec(memory_space=pltpu.MemorySpace.VMEM)
    out = pl.pallas_call(
        rnn_kernel,
        out_shape=jax.ShapeDtypeStruct((B, O), jnp.float32),
        in_specs=[vmem, vmem, vmem, vmem, vmem],
        out_specs=vmem,
        # TODO(synk): for production H (>=2048) / long T, tile T into VMEM-sized
        # chunks and use bf16 weights + a "parallel" batch grid axis (v7x).
    )(x, w_in_t, w_rec_t, w_out_t, b)
    return out


def reference_forward(x, w_in, w_rec, w_out, b_out):
    """Pure-JAX reference of the PyTorch forward."""
    B, T, I = x.shape
    H = w_rec.shape[0]
    h = jnp.zeros((B, H), jnp.float32)
    for t in range(T):
        h = jax.nn.relu(x[:, t, :] @ w_in.T + h @ w_rec.T)
    return h @ w_out.T + b_out


def init_params(key, input_size, hidden_size, output_size):
    """Deterministic init mirroring proj_net.reset_parameters()."""
    k_in, k_out, k_b = jax.random.split(key, 3)
    # nn.init.eye_ on the recurrent kernel
    w_rec = jnp.eye(hidden_size, dtype=jnp.float32)
    # xavier_uniform_(input_kernel.weight, gain=1.0); weight shape (H, I)
    bound_in = (6.0 / (input_size + hidden_size)) ** 0.5
    w_in = jax.random.uniform(
        k_in, (hidden_size, input_size), jnp.float32, -bound_in, bound_in
    )
    # xavier_uniform_(output_layer.weight, gain=0.5); weight shape (O, H)
    bound_out = 0.5 * (6.0 / (hidden_size + output_size)) ** 0.5
    w_out = jax.random.uniform(
        k_out, (output_size, hidden_size), jnp.float32, -bound_out, bound_out
    )
    # nn.Linear default bias init: U(-1/sqrt(fan_in), 1/sqrt(fan_in))
    bb = 1.0 / (hidden_size ** 0.5)
    b_out = jax.random.uniform(k_b, (output_size,), jnp.float32, -bb, bb)
    return w_in, w_rec, w_out, b_out


if __name__ == "__main__":
    # Small shapes consistent with the adding task: (batch, seq_len, input_size=2)
    B, T, I, H, O = 2, 8, 2, 32, 1

    key = jax.random.PRNGKey(0)
    k_x, k_p = jax.random.split(key)
    x = jax.random.normal(k_x, (B, T, I), jnp.float32)
    w_in, w_rec, w_out, b_out = init_params(k_p, I, H, O)

    out = proj_net_forward(x, w_in, w_rec, w_out, b_out)
    out = jax.block_until_ready(out)

    ref = reference_forward(x, w_in, w_rec, w_out, b_out)
    assert out.shape == (B, O)
    assert jnp.allclose(out, ref, atol=1e-5, rtol=1e-5), (out, ref)

    print("KERNEL_OK")
</pallas_src>

<mosaic_0001>
module attributes {stable_mosaic.version = 11 : i64} {
  func.func @rnn_kernel(%arg0: memref<2x8x2xf32, #tpu.memory_space<vmem>>, %arg1: memref<2x32xf32, #tpu.memory_space<vmem>>, %arg2: memref<32x32xf32, #tpu.memory_space<vmem>>, %arg3: memref<32x1xf32, #tpu.memory_space<vmem>>, %arg4: memref<1x1xf32, #tpu.memory_space<vmem>>, %arg5: memref<2x1xf32, #tpu.memory_space<vmem>>) attributes {dimension_semantics = [], scalar_prefetch = 0 : i64, scratch_operands = 0 : i64, tpu.core_type = #tpu.core_type<tc>} {
    %c0 = arith.constant 0 : index
    %c0_0 = arith.constant 0 : index
    %c0_1 = arith.constant 0 : index
    %0 = vector.load %arg0[%c0, %c0_0, %c0_1] : memref<2x8x2xf32, #tpu.memory_space<vmem>>, vector<2x8x2xf32>
    %c0_2 = arith.constant 0 : index
    %c0_3 = arith.constant 0 : index
    %1 = vector.load %arg1[%c0_2, %c0_3] : memref<2x32xf32, #tpu.memory_space<vmem>>, vector<2x32xf32>
    %c0_4 = arith.constant 0 : index
    %c0_5 = arith.constant 0 : index
    %2 = vector.load %arg2[%c0_4, %c0_5] : memref<32x32xf32, #tpu.memory_space<vmem>>, vector<32x32xf32>
    %3 = vector.shape_cast %0 : vector<2x8x2xf32> to vector<16x2xf32>
    %cst = arith.constant dense<0.000000e+00> : vector<16x32xf32>
    %4 = tpu.matmul %3, %1, %cst {dimension_numbers = #tpu.dot_dimension_numbers<[1], [0], [0], [1], [0, 0, 1, 1], [], []>} : vector<16x2xf32>, vector<2x32xf32>, vector<16x32xf32> -> vector<16x32xf32>
    %5 = vector.shape_cast %4 : vector<16x32xf32> to vector<2x8x32xf32>
    %6 = vector.extract_strided_slice %5 {offsets = [0, 0, 0], sizes = [2, 1, 32], strides = [1, 1, 1]} : vector<2x8x32xf32> to vector<2x1x32xf32>
    %7 = vector.shape_cast %6 : vector<2x1x32xf32> to vector<2x32xf32>
    %cst_6 = arith.constant 0.000000e+00 : f32
    %8 = vector.broadcast %cst_6 : f32 to vector<2x32xf32>
    %9 = arith.maximumf %7, %8 : vector<2x32xf32>
    %10 = vector.extract_strided_slice %5 {offsets = [0, 1, 0], sizes = [2, 1, 32], strides = [1, 1, 1]} : vector<2x8x32xf32> to vector<2x1x32xf32>
    %11 = vector.shape_cast %10 : vector<2x1x32xf32> to vector<2x32xf32>
    %cst_7 = arith.constant dense<0.000000e+00> : vector<2x32xf32>
    %12 = tpu.matmul %9, %2, %cst_7 {dimension_numbers = #tpu.dot_dimension_numbers<[1], [0], [0], [1], [0, 0, 1, 1], [], []>} : vector<2x32xf32>, vector<32x32xf32>, vector<2x32xf32> -> vector<2x32xf32>
    %13 = arith.addf %11, %12 : vector<2x32xf32>
    %cst_8 = arith.constant 0.000000e+00 : f32
    %14 = vector.broadcast %cst_8 : f32 to vector<2x32xf32>
    %15 = arith.maximumf %13, %14 : vector<2x32xf32>
    %16 = vector.extract_strided_slice %5 {offsets = [0, 2, 0], sizes = [2, 1, 32], strides = [1, 1, 1]} : vector<2x8x32xf32> to vector<2x1x32xf32>
    %17 = vector.shape_cast %16 : vector<2x1x32xf32> to vector<2x32xf32>
    %cst_9 = arith.constant dense<0.000000e+00> : vector<2x32xf32>
    %18 = tpu.matmul %15, %2, %cst_9 {dimension_numbers = #tpu.dot_dimension_numbers<[1], [0], [0], [1], [0, 0, 1, 1], [], []>} : vector<2x32xf32>, vector<32x32xf32>, vector<2x32xf32> -> vector<2x32xf32>
    %19 = arith.addf %17, %18 : vector<2x32xf32>
    %cst_10 = arith.constant 0.000000e+00 : f32
    %20 = vector.broadcast %cst_10 : f32 to vector<2x32xf32>
    %21 = arith.maximumf %19, %20 : vector<2x32xf32>
    %22 = vector.extract_strided_slice %5 {offsets = [0, 3, 0], sizes = [2, 1, 32], strides = [1, 1, 1]} : vector<2x8x32xf32> to vector<2x1x32xf32>
    %23 = vector.shape_cast %22 : vector<2x1x32xf32> to vector<2x32xf32>
    %cst_11 = arith.constant dense<0.000000e+00> : vector<2x32xf32>
    %24 = tpu.matmul %21, %2, %cst_11 {dimension_numbers = #tpu.dot_dimension_numbers<[1], [0], [0], [1], [0, 0, 1, 1], [], []>} : vector<2x32xf32>, vector<32x32xf32>, vector<2x32xf32> -> vector<2x32xf32>
    %25 = arith.addf %23, %24 : vector<2x32xf32>
    %cst_12 = arith.constant 0.000000e+00 : f32
    %26 = vector.broadcast %cst_12 : f32 to vector<2x32xf32>
    %27 = arith.maximumf %25, %26 : vector<2x32xf32>
    %28 = vector.extract_strided_slice %5 {offsets = [0, 4, 0], sizes = [2, 1, 32], strides = [1, 1, 1]} : vector<2x8x32xf32> to vector<2x1x32xf32>
    %29 = vector.shape_cast %28 : vector<2x1x32xf32> to vector<2x32xf32>
    %cst_13 = arith.constant dense<0.000000e+00> : vector<2x32xf32>
    %30 = tpu.matmul %27, %2, %cst_13 {dimension_numbers = #tpu.dot_dimension_numbers<[1], [0], [0], [1], [0, 0, 1, 1], [], []>} : vector<2x32xf32>, vector<32x32xf32>, vector<2x32xf32> -> vector<2x32xf32>
    %31 = arith.addf %29, %30 : vector<2x32xf32>
    %cst_14 = arith.constant 0.000000e+00 : f32
    %32 = vector.broadcast %cst_14 : f32 to vector<2x32xf32>
    %33 = arith.maximumf %31, %32 : vector<2x32xf32>
    %34 = vector.extract_strided_slice %5 {offsets = [0, 5, 0], sizes = [2, 1, 32], strides = [1, 1, 1]} : vector<2x8x32xf32> to vector<2x1x32xf32>
    %35 = vector.shape_cast %34 : vector<2x1x32xf32> to vector<2x32xf32>
    %cst_15 = arith.constant dense<0.000000e+00> : vector<2x32xf32>
    %36 = tpu.matmul %33, %2, %cst_15 {dimension_numbers = #tpu.dot_dimension_numbers<[1], [0], [0], [1], [0, 0, 1, 1], [], []>} : vector<2x32xf32>, vector<32x32xf32>, vector<2x32xf32> -> vector<2x32xf32>
    %37 = arith.addf %35, %36 : vector<2x32xf32>
    %cst_16 = arith.constant 0.000000e+00 : f32
    %38 = vector.broadcast %cst_16 : f32 to vector<2x32xf32>
    %39 = arith.maximumf %37, %38 : vector<2x32xf32>
    %40 = vector.extract_strided_slice %5 {offsets = [0, 6, 0], sizes = [2, 1, 32], strides = [1, 1, 1]} : vector<2x8x32xf32> to vector<2x1x32xf32>
    %41 = vector.shape_cast %40 : vector<2x1x32xf32> to vector<2x32xf32>
    %cst_17 = arith.constant dense<0.000000e+00> : vector<2x32xf32>
    %42 = tpu.matmul %39, %2, %cst_17 {dimension_numbers = #tpu.dot_dimension_numbers<[1], [0], [0], [1], [0, 0, 1, 1], [], []>} : vector<2x32xf32>, vector<32x32xf32>, vector<2x32xf32> -> vector<2x32xf32>
    %43 = arith.addf %41, %42 : vector<2x32xf32>
    %cst_18 = arith.constant 0.000000e+00 : f32
    %44 = vector.broadcast %cst_18 : f32 to vector<2x32xf32>
    %45 = arith.maximumf %43, %44 : vector<2x32xf32>
    %46 = vector.extract_strided_slice %5 {offsets = [0, 7, 0], sizes = [2, 1, 32], strides = [1, 1, 1]} : vector<2x8x32xf32> to vector<2x1x32xf32>
    %47 = vector.shape_cast %46 : vector<2x1x32xf32> to vector<2x32xf32>
    %cst_19 = arith.constant dense<0.000000e+00> : vector<2x32xf32>
    %48 = tpu.matmul %45, %2, %cst_19 {dimension_numbers = #tpu.dot_dimension_numbers<[1], [0], [0], [1], [0, 0, 1, 1], [], []>} : vector<2x32xf32>, vector<32x32xf32>, vector<2x32xf32> -> vector<2x32xf32>
    %49 = arith.addf %47, %48 : vector<2x32xf32>
    %cst_20 = arith.constant 0.000000e+00 : f32
    %50 = vector.broadcast %cst_20 : f32 to vector<2x32xf32>
    %51 = arith.maximumf %49, %50 : vector<2x32xf32>
    %c0_21 = arith.constant 0 : index
    %c0_22 = arith.constant 0 : index
    %52 = vector.load %arg3[%c0_21, %c0_22] : memref<32x1xf32, #tpu.memory_space<vmem>>, vector<32x1xf32>
    %cst_23 = arith.constant dense<0.000000e+00> : vector<2x1xf32>
    %53 = tpu.matmul %51, %52, %cst_23 {dimension_numbers = #tpu.dot_dimension_numbers<[1], [0], [0], [1], [0, 0, 1, 1], [], []>} : vector<2x32xf32>, vector<32x1xf32>, vector<2x1xf32> -> vector<2x1xf32>
    %c0_24 = arith.constant 0 : index
    %c0_25 = arith.constant 0 : index
    %54 = vector.load %arg4[%c0_24, %c0_25] : memref<1x1xf32, #tpu.memory_space<vmem>>, vector<1x1xf32>
    %55 = vector.broadcast %54 : vector<1x1xf32> to vector<2x1xf32>
    %56 = arith.addf %53, %55 : vector<2x1xf32>
    %c0_26 = arith.constant 0 : index
    %c0_27 = arith.constant 0 : index
    %57 = vector.load %arg5[%c0_26, %c0_27] : memref<2x1xf32, #tpu.memory_space<vmem>>, vector<2x1xf32>
    tpu.vector_store %arg5[%c0_26, %c0_27], %56 {strides = array<i32>} : memref<2x1xf32, #tpu.memory_space<vmem>>, vector<2x1xf32>,
    return
  }
}

</mosaic_0001>

<bundles_post_ra>
// kernel: tpu_custom_call.1
= control target key start
LH: loop header
LB: loop body
LE: loop exit
PB: predicated region body
PF: predicated region fallthrough
CT: control target
= control target key end

     0   :  { %vm36_vm0 = vcmask 1041408   ;;  %vm29_vm1 = vcmask 15360   ;;  %v1011_v3 = vmov 0.0|0.0   ;;  %vm1012_vm2 = vmmov 0   ;;  %s1169_s1 = inlined_call_operand.vmem [shape: f32[2,32], index: 1, kind: input, shape index: {}]   ;;  %s1170_s0 = inlined_call_operand.vmem [shape: f32[2,8,2], index: 0, kind: input, shape index: {}]   ;;  %s1171_s2 = inlined_call_operand.vmem [shape: f32[32,32], index: 2, kind: input, shape index: {}]   ;;  %s1172_s3 = inlined_call_operand.vmem [shape: f32[32,1], index: 3, kind: input, shape index: {}]   ;;  %s1173_s4 = inlined_call_operand.<no memory space> [shape: f32[1,1], index: 4, kind: input, shape index: {}]   ;;  %s1174_s5 = inlined_call_operand.vmem [shape: f32[2,1], index: 5, kind: output, shape index: {}]  }
   0x1   :  { %v24_v0 = vld [vmem:[%s1169_s1] sm:$0x3]  ;;  %v23_v2 = vld [vmem:[%s1170_s0 + $0x8] sm:$0xff]  ;;  %960 = vmatprep.subr.bf16.mxu1 %v1011_v3  ;;  %v27_v7 = vld [vmem:[%s1171_s2 + $0x10] sm:$0xff]  ;;  %v1013_v10 = vmov 0.0   ;;  %vm120_vm3 = vcmask 1041409  }
   0x2   :  { %v22_v1 = vld [vmem:[%s1170_s0] sm:$0xff]  ;;  %867 = vmatprep.subr.msk.mxu0 %vm36_vm0, %v24_v0  ;;  %v26_v5 = vld [vmem:[%s1171_s2 + $0x8] sm:$0xff]  ;;  %v28_v8 = vld [vmem:[%s1171_s2 + $0x18] sm:$0xff]  ;;  %880 = vmatprep.mubr.msk.f32.mxu1 %vm1012_vm2, %v1013_v10  ;;  %vm122_vm4 = vcmask 261120   ;;  %vm806_vm5 = vcmask 1024  }
   0x3   :  { %869 = vmatprep.mubr.msk.f32.mxu0 %vm29_vm1, %v22_v1  ;;  %v25_v4 = vld [vmem:[%s1171_s2] sm:$0xff]  ;;  %868 = vmatpush3.msk.msra.mxu0 %vm36_vm0, %v24_v0  ;;  %v1073_v9 = vpack.c.bf16 %v28_v8, %v27_v7 }
   0x4   :  { %v1060_v6 = vpack.c.bf16 %v26_v5, %v25_v4  ;;  %870 = vmatmul.mubr.msk.f32.vlgmr.msra.gmra.mrb[0].mxu0 %vm29_vm1, %v23_v2  ;;  %966 = vmatprep.subr.bf16.mxu0 %v1011_v3 }
   0x5   :  { %891 = vmatprep.mubr.msk.f32.mxu0 %vm1012_vm2, %v1013_v10 }
   0x6   :  { %962 = vmatpush3.bf16.msra.mxu1 %v1060_v6  ;;  %968 = vmatpush3.bf16.msra.mxu0 %v1060_v6 }
   0x7   :  { %963 = vmatprep.subr.bf16.mxu1 %v1011_v3  ;;  %969 = vmatprep.subr.bf16.mxu0 %v1011_v3 }
   0xa   :  { %965 = vmatpush3.bf16.msra.mxu1 %v1073_v9  ;;  %971 = vmatpush3.bf16.msra.mxu0 %v1073_v9 }
   0xb   :  { %972 = vmatprep.subr.bf16.mxu1 %v1011_v3  ;;  %978 = vmatprep.subr.bf16.mxu0 %v1011_v3 }
  0xd7   :  { %v1083_v11 = vpop.f32.mrb[0].mxu0 }
  0xd8   :  { %v1085_v12 = vpop.f32.mrb[1].mxu0  ;;  %v116_v13 = vmax.f32 %v1083_v11, 0.0 }
  0xd9   :  { %v115_v14 = vmax.f32 %v1085_v12, 0.0 }
  0xda   :  { %v119_v15 = vrot.slane %v116_v13, 7 }
  0xdc   :  { %v121_v16 = vsel %vm120_vm3, %v119_v15, %v115_v14 }
  0xdd   :  { %881 = vmatmul.mubr.msk.f32.vlgmr.msra.gmra.mrb[0].mxu1 %vm122_vm4, %v121_v16 }
  0xde   :  { %974 = vmatpush3.bf16.msra.mxu1 %v1060_v6  ;;  %902 = vmatprep.mubr.msk.f32.mxu1 %vm1012_vm2, %v1013_v10 }
  0xdf   :  { %975 = vmatprep.subr.bf16.mxu1 %v1011_v3 }
  0xe2   :  { %977 = vmatpush3.bf16.msra.mxu1 %v1073_v9 }
  0xe3   :  { %984 = vmatprep.subr.bf16.mxu1 %v1011_v3 }
 0x1b0   :  { %v191_v17 = vpop.f32.mrb[0].mxu1 }
 0x1b1   :  { %v196_v18 = vrot.slane %v191_v17, 7  ;;  %v200_v19 = vadd.f32 %v1083_v11, %v191_v17  ;;  %v882_v20 = vpop.f32.mrb[1].mxu1 }
 0x1b3   :  { %v199_v21 = vadd.f32 %v196_v18, %v1085_v12  ;;  %v202_v23 = vmax.f32 %v200_v19, 0.0 }
 0x1b5   :  { %v201_v22 = vmax.f32 %v199_v21, 0.0  ;;  %v719_v21 = vld [vmem:[%s1172_s3 + $0x8] sm:$0xff] }
 0x1b7   :  { %v205_v24 = vrot.slane %v201_v22, 1 }
 0x1b9   :  { %v206_v25 = vsel %vm120_vm3, %v202_v23, %v205_v24  ;;  %v720_v23 = vld [vmem:[%s1172_s3 + $0x10] sm:$0xff]  ;;  %v721_v24 = vld [vmem:[%s1172_s3 + $0x18] sm:$0xff] }
 0x1ba   :  { %892 = vmatmul.mubr.msk.f32.vlgmr.msra.gmra.mrb[2].mxu0 %vm122_vm4, %v206_v25  ;;  %v1006_v25 = vpack.c.bf16 %v721_v24, %v720_v23 }
 0x1bb   :  { %980 = vmatpush3.bf16.msra.mxu0 %v1060_v6  ;;  %913 = vmatprep.mubr.msk.f32.mxu0 %vm1012_vm2, %v1013_v10 }
 0x1bc   :  { %981 = vmatprep.subr.bf16.mxu0 %v1011_v3 }
 0x1bf   :  { %983 = vmatpush3.bf16.msra.mxu0 %v1073_v9 }
 0x1c0   :  { %990 = vmatprep.subr.bf16.mxu0 %v1011_v3 }
 0x28d   :  { %v275_v26 = vpop.f32.mrb[2].mxu0 }
 0x28e   :  { %v280_v27 = vrot.slane %v275_v26, 6  ;;  %v281_v28 = vrot.slane %v275_v26, 7  ;;  %v893_v29 = vpop.f32.mrb[3].mxu0  ;;  %v10_v26 = vstv %s1173_s4 }
 0x28f   :  { %11 = vst [vmem:[#allocation2] sm:$0x1] %v10_v26 }
 0x290   :  { %v284_v30 = vadd.f32 %v280_v27, %v1085_v12  ;;  %v285_v31 = vadd.f32 %v1083_v11, %v281_v28 }
 0x292   :  { %v286_v32 = vmax.f32 %v284_v30, 0.0  ;;  %v287_v33 = vmax.f32 %v285_v31, 0.0 }
 0x294   :  { %v290_v34 = vrot.slane %v286_v32, 2  ;;  %v291_v35 = vrot.slane %v287_v33, 1 }
 0x296   :  { %v292_v36 = vsel %vm120_vm3, %v291_v35, %v290_v34 }
 0x297   :  { %903 = vmatmul.mubr.msk.f32.vlgmr.msra.gmra.mrb[2].mxu1 %vm122_vm4, %v292_v36 }
 0x298   :  { %986 = vmatpush3.bf16.msra.mxu1 %v1060_v6  ;;  %924 = vmatprep.mubr.msk.f32.mxu1 %vm1012_vm2, %v1013_v10 }
 0x299   :  { %987 = vmatprep.subr.bf16.mxu1 %v1011_v3 }
 0x29c   :  { %989 = vmatpush3.bf16.msra.mxu1 %v1073_v9 }
 0x29d   :  { %996 = vmatprep.subr.bf16.mxu1 %v1011_v3 }
 0x36a   :  { %v361_v37 = vpop.f32.mrb[2].mxu1 }
 0x36b   :  { %v366_v38 = vrot.slane %v361_v37, 5  ;;  %v367_v39 = vrot.slane %v361_v37, 6  ;;  %v904_v40 = vpop.f32.mrb[3].mxu1  ;;  %v822_v37 = vld [vmem:[#allocation2] ss:$0 sm:$0xff] }
 0x36d   :  { %v370_v41 = vadd.f32 %v366_v38, %v1085_v12  ;;  %v371_v42 = vadd.f32 %v1083_v11, %v367_v39 }
 0x36f   :  { %v372_v43 = vmax.f32 %v370_v41, 0.0  ;;  %v373_v44 = vmax.f32 %v371_v42, 0.0 }
 0x371   :  { %v376_v45 = vrot.slane %v372_v43, 3  ;;  %v377_v46 = vrot.slane %v373_v44, 2 }
 0x373   :  { %v378_v47 = vsel %vm120_vm3, %v377_v46, %v376_v45 }
 0x374   :  { %914 = vmatmul.mubr.msk.f32.vlgmr.msra.gmra.mrb[4].mxu0 %vm122_vm4, %v378_v47 }
 0x375   :  { %992 = vmatpush3.bf16.msra.mxu0 %v1060_v6  ;;  %935 = vmatprep.mubr.msk.f32.mxu0 %vm1012_vm2, %v1013_v10 }
 0x376   :  { %993 = vmatprep.subr.bf16.mxu0 %v1011_v3 }
 0x379   :  { %995 = vmatpush3.bf16.msra.mxu0 %v1073_v9 }
 0x37a   :  { %1002 = vmatprep.subr.bf16.mxu0 %v1011_v3 }
 0x447   :  { %v447_v48 = vpop.f32.mrb[4].mxu0 }
 0x448   :  { %v452_v49 = vrot.slane %v447_v48, 4  ;;  %v453_v50 = vrot.slane %v447_v48, 5  ;;  %v915_v51 = vpop.f32.mrb[5].mxu0 }
 0x44a   :  { %v456_v52 = vadd.f32 %v452_v49, %v1085_v12  ;;  %v457_v53 = vadd.f32 %v1083_v11, %v453_v50 }
 0x44c   :  { %v458_v54 = vmax.f32 %v456_v52, 0.0  ;;  %v459_v55 = vmax.f32 %v457_v53, 0.0 }
 0x44e   :  { %v462_v56 = vrot.slane %v458_v54, 4  ;;  %v463_v57 = vrot.slane %v459_v55, 3 }
 0x450   :  { %v464_v58 = vsel %vm120_vm3, %v463_v57, %v462_v56 }
 0x451   :  { %925 = vmatmul.mubr.msk.f32.vlgmr.msra.gmra.mrb[4].mxu1 %vm122_vm4, %v464_v58 }
 0x452   :  { %998 = vmatpush3.bf16.msra.mxu1 %v1060_v6  ;;  %946 = vmatprep.mubr.msk.f32.mxu1 %vm1012_vm2, %v1013_v10 }
 0x453   :  { %999 = vmatprep.subr.bf16.mxu1 %v1011_v3 }
 0x456   :  { %1001 = vmatpush3.bf16.msra.mxu1 %v1073_v9 }
 0x524   :  { %v533_v59 = vpop.f32.mrb[4].mxu1 }
 0x525   :  { %v538_v60 = vrot.slane %v533_v59, 3  ;;  %v539_v61 = vrot.slane %v533_v59, 4  ;;  %v926_v62 = vpop.f32.mrb[5].mxu1 }
 0x527   :  { %v542_v63 = vadd.f32 %v538_v60, %v1085_v12  ;;  %v543_v0 = vadd.f32 %v1083_v11, %v539_v61 }
 0x529   :  { %v544_v1 = vmax.f32 %v542_v63, 0.0  ;;  %v545_v2 = vmax.f32 %v543_v0, 0.0 }
 0x52b   :  { %v548_v4 = vrot.slane %v544_v1, 5  ;;  %v549_v5 = vrot.slane %v545_v2, 4 }
 0x52d   :  { %v550_v6 = vsel %vm120_vm3, %v549_v5, %v548_v4 }
 0x52e   :  { %936 = vmatmul.mubr.msk.f32.vlgmr.msra.gmra.mrb[6].mxu0 %vm122_vm4, %v550_v6 }
 0x52f   :  { %957 = vmatprep.mubr.msk.f32.mxu0 %vm1012_vm2, %v1013_v10  ;;  %v718_v10 = vld [vmem:[%s1172_s3] sm:$0xff] }
 0x530   :  { %v1003_v22 = vpack.c.bf16 %v719_v21, %v718_v10 }
 0x532   :  { %1004 = vmatpush3.bf16.msra.mxu0 %v1003_v22 }
 0x533   :  { %1005 = vmatprep.subr.bf16.mxu0 %v1011_v3 }
 0x536   :  { %1007 = vmatpush3.bf16.msra.mxu0 %v1006_v25 }
 0x601   :  { %v619_v7 = vpop.f32.mrb[6].mxu0 }
 0x602   :  { %v624_v8 = vrot.slane %v619_v7, 2  ;;  %v625_v9 = vrot.slane %v619_v7, 3  ;;  %v937_v13 = vpop.f32.mrb[7].mxu0 }
 0x604   :  { %v628_v14 = vadd.f32 %v624_v8, %v1085_v12  ;;  %v629_v15 = vadd.f32 %v1083_v11, %v625_v9 }
 0x606   :  { %v630_v16 = vmax.f32 %v628_v14, 0.0  ;;  %v631_v17 = vmax.f32 %v629_v15, 0.0 }
 0x608   :  { %v634_v18 = vrot.slane %v630_v16, 6  ;;  %v635_v19 = vrot.slane %v631_v17, 5 }
 0x60a   :  { %v636_v20 = vsel %vm120_vm3, %v635_v19, %v634_v18 }
 0x60b   :  { %947 = vmatmul.mubr.msk.f32.vlgmr.msra.gmra.mrb[6].mxu1 %vm122_vm4, %v636_v20 }
 0x6de   :  { %v705_v27 = vpop.f32.mrb[6].mxu1 }
 0x6df   :  { %v710_v28 = vrot.slane %v705_v27, 1  ;;  %v711_v29 = vrot.slane %v705_v27, 2  ;;  %v948_v30 = vpop.f32.mrb[7].mxu1 }
 0x6e1   :  { %v714_v3 = vadd.f32 %v710_v28, %v1085_v12  ;;  %v715_v31 = vadd.f32 %v1083_v11, %v711_v29 }
 0x6e3   :  { %v716_v32 = vmax.f32 %v714_v3, 0.0  ;;  %v717_v33 = vmax.f32 %v715_v31, 0.0 }
 0x6e5   :  { %v731_v34 = vrot.slane %v716_v32, 7  ;;  %v732_v35 = vrot.slane %v717_v33, 6 }
 0x6e7   :  { %v733_v36 = vsel %vm120_vm3, %v732_v35, %v731_v34 }
 0x6e8   :  { %958 = vmatmul.mubr.msk.f32.vlgmr.msra.gmra.mrb[8].mxu0 %vm122_vm4, %v733_v36 }
 0x7bb   :  { %v802_v38 = vpop.f32.mrb[8].mxu0 }
 0x7bc   :  { %v803_v39 = vadd.f32 %v822_v37, %v802_v38  ;;  %v959_v40 = vpop.f32.mrb[9].mxu0 }
 0x7be   :  { %807 = vst.msk [vmem:[%s1174_s5] sm:$0x3] %vm806_vm5, %v803_v39 }

</bundles_post_ra>
